<compile_context>
chip_gen: v6e
topology: v6e:2x2x1
jax: 0.10.0
libtpu: 0.0.40
codegen_flags: <defaults>
</compile_context>

<pallas_src>
import functools

import jax
import jax.numpy as jnp
from jax import lax
from jax.experimental import pallas as pl
from jax.experimental.pallas import tpu as pltpu

HIDDEN_STATE_SIZE = 32
OUTPUT_STATE_SIZE = 2
POSITION_FEATURE_DIM = 29


def _round_up(x, m):
    return (x + m - 1) // m * m


def _gru_fc_fused_kernel(
    x_ref,      # (T, Bb, I)   raw inputs
    h0_ref,     # (Bb, H)      initial hidden
    w_i_ref,    # (I, 3H)      fused input weights, column blocks [r|z|n]
    w_h_ref,    # (H, 3H)      fused hidden weights, column blocks [r|z|n]
    b_x_ref,    # (1, 3H)      folded biases: [b_ir+b_hr | b_iz+b_hz | b_in]
    b_hn_ref,   # (1, H)       hidden-side bias of the n gate (stays inside r*(...))
    w_fc_ref,   # (H, O)       FC weights (transposed)
    b_fc_ref,   # (1, O)       FC bias
    y_ref,      # (T, Bb, O)   final output
    hT_ref,     # (Bb, H)      final hidden state
    gx_ref,     # VMEM (T, Bb, 3H) scratch: input projection
    hs_ref,     # VMEM (T, Bb, H)  scratch: hidden sequence (never hits HBM)
):
    T, Bb, I = x_ref.shape
    H = hT_ref.shape[-1]

    # ---- Prologue: bulk input projection, one MXU matmul off the serial chain.
    x2d = x_ref[...].reshape(T * Bb, I)
    gx2d = jnp.dot(x2d, w_i_ref[...], preferred_element_type=jnp.float32) + b_x_ref[...]
    gx_ref[...] = gx2d.reshape(T, Bb, 3 * H)

    # ---- Loop-invariant loads hoisted off the recurrence critical path.
    w_h = w_h_ref[...]          # (H, 3H)
    b_hn = b_hn_ref[...]        # (1, H)

    def step(t, h_prev):
        g_x = gx_ref[t]                                                   # (Bb, 3H)
        # One fused hidden matmul per step on the serial dependence chain.
        g_h = jnp.dot(h_prev, w_h, preferred_element_type=jnp.float32)   # (Bb, 3H)

        # r and z share one sigmoid on the 2H-wide slab (one EUP push).
        rz = jax.nn.sigmoid(g_x[:, :2 * H] + g_h[:, :2 * H])
        r = rz[:, :H]
        z = rz[:, H:]
        n = jnp.tanh(g_x[:, 2 * H:] + r * (g_h[:, 2 * H:] + b_hn))
        h_new = n + z * (h_prev - n)                                       # (1-z)n + z h

        hs_ref[t] = h_new
        return h_new

    unroll = True if T <= 32 else 8
    h_final = lax.fori_loop(0, T, step, h0_ref[...].astype(jnp.float32),
                            unroll=unroll)
    hT_ref[...] = h_final.astype(hT_ref.dtype)

    # ---- Epilogue: fused Linear(32->2), one bulk matmul on the VMEM hidden seq.
    hs2d = hs_ref[...].reshape(T * Bb, H)
    y2d = jnp.dot(hs2d, w_fc_ref[...], preferred_element_type=jnp.float32) + b_fc_ref[...]
    y_ref[...] = y2d.reshape(T, Bb, y_ref.shape[-1]).astype(y_ref.dtype)


@functools.partial(jax.jit, static_argnames=("num_batch_blocks",))
def position_embedding_network(x, h_0, params, *, num_batch_blocks=1):
    """x: (B, T, 29) f32, h_0: (1, B, 32) f32 -> ((B, T, 2), (1, B, 32))."""
    B, T, I = x.shape
    H, O = HIDDEN_STATE_SIZE, OUTPUT_STATE_SIZE
    assert I == POSITION_FEATURE_DIM
    assert h_0.shape == (1, B, H)

    w_ih = params["weight_ih_l0"]   # (3H, I), row blocks [r, z, n]
    w_hh = params["weight_hh_l0"]   # (3H, H)
    b_ih = params["bias_ih_l0"]     # (3H,)
    b_hh = params["bias_hh_l0"]     # (3H,)
    w_fc = params["fc_weight"]      # (O, H)
    b_fc = params["fc_bias"]        # (O,)

    # Fused / transposed weights: column blocks [r | z | n].
    w_i_cat = w_ih.T.astype(jnp.float32)                         # (I, 3H)
    w_h_cat = w_hh.T.astype(jnp.float32)                         # (H, 3H)
    # Fold biases: r/z gates get (b_i + b_h); n gate gets only b_in here
    # (b_hn must stay inside the r*(...) term per the PyTorch GRU definition).
    b_x = jnp.concatenate(
        [b_ih[:2 * H] + b_hh[:2 * H], b_ih[2 * H:]]
    ).reshape(1, 3 * H).astype(jnp.float32)
    b_hn = b_hh[2 * H:].reshape(1, H).astype(jnp.float32)
    w_fc_t = w_fc.T.astype(jnp.float32)                          # (H, O)
    b_fc2 = b_fc.reshape(1, O).astype(jnp.float32)               # (1, O)

    # One grid block by default (v5e/v6e: grid is a serial loop, fragmentation only
    # costs overhead); set num_batch_blocks=2 to use both v7x TensorCores.
    nb = num_batch_blocks
    Bp = _round_up(B, 8 * nb)       # sublane-aligned batch per block
    Bb = Bp // nb

    x_tm = jnp.transpose(x, (1, 0, 2)).astype(jnp.float32)       # (T, B, I)
    h0 = h_0[0].astype(jnp.float32)                              # (B, H)
    if Bp != B:
        x_tm = jnp.pad(x_tm, ((0, 0), (0, Bp - B), (0, 0)))
        h0 = jnp.pad(h0, ((0, Bp - B), (0, 0)))

    grid_spec = pltpu.PrefetchScalarGridSpec(
        num_scalar_prefetch=0,
        grid=(nb,),
        in_specs=[
            pl.BlockSpec((T, Bb, I), lambda b: (0, b, 0)),        # x
            pl.BlockSpec((Bb, H), lambda b: (b, 0)),              # h0
            pl.BlockSpec((I, 3 * H), lambda b: (0, 0)),           # w_i (invariant)
            pl.BlockSpec((H, 3 * H), lambda b: (0, 0)),           # w_h (invariant)
            pl.BlockSpec((1, 3 * H), lambda b: (0, 0)),           # b_x (invariant)
            pl.BlockSpec((1, H), lambda b: (0, 0)),               # b_hn (invariant)
            pl.BlockSpec((H, O), lambda b: (0, 0)),               # w_fc (invariant)
            pl.BlockSpec((1, O), lambda b: (0, 0)),               # b_fc (invariant)
        ],
        out_specs=(
            pl.BlockSpec((T, Bb, O), lambda b: (0, b, 0)),        # y
            pl.BlockSpec((Bb, H), lambda b: (b, 0)),              # final hidden
        ),
        scratch_shapes=[
            pltpu.VMEM((T, Bb, 3 * H), jnp.float32),              # gx (stays on-chip)
            pltpu.VMEM((T, Bb, H), jnp.float32),                  # hs (stays on-chip)
        ],
    )

    y_t, h_T = pl.pallas_call(
        _gru_fc_fused_kernel,
        out_shape=(
            jax.ShapeDtypeStruct((T, Bp, O), jnp.float32),
            jax.ShapeDtypeStruct((Bp, H), jnp.float32),
        ),
        grid_spec=grid_spec,
        compiler_params=pltpu.CompilerParams(
            dimension_semantics=("parallel",)),
    )(x_tm, h0, w_i_cat, w_h_cat, b_x, b_hn, w_fc_t, b_fc2)

    output = jnp.transpose(y_t, (1, 0, 2))[:B]                    # (B, T, O)
    return output, h_T[:B][None, :, :]                            # (1, B, H)


def init_params(key):
    """Deterministic synthetic parameters with the same shapes as the PyTorch module."""
    H, I, O = HIDDEN_STATE_SIZE, POSITION_FEATURE_DIM, OUTPUT_STATE_SIZE
    k = jax.random.split(key, 6)
    s = 1.0 / jnp.sqrt(H)
    return {
        "weight_ih_l0": jax.random.uniform(k[0], (3 * H, I), jnp.float32, -s, s),
        "weight_hh_l0": jax.random.uniform(k[1], (3 * H, H), jnp.float32, -s, s),
        "bias_ih_l0":   jax.random.uniform(k[2], (3 * H,),   jnp.float32, -s, s),
        "bias_hh_l0":   jax.random.uniform(k[3], (3 * H,),   jnp.float32, -s, s),
        "fc_weight":    jax.random.uniform(k[4], (O, H),     jnp.float32, -s, s),
        "fc_bias":      jax.random.uniform(k[5], (O,),       jnp.float32, -s, s),
    }


def _reference_forward(x, h_0, params):
    """Pure-JAX reference of the PyTorch GRU + Linear forward."""
    H = HIDDEN_STATE_SIZE
    w_ih, w_hh = params["weight_ih_l0"], params["weight_hh_l0"]
    b_ih, b_hh = params["bias_ih_l0"], params["bias_hh_l0"]
    w_fc, b_fc = params["fc_weight"], params["fc_bias"]

    def cell(h, x_t):
        gi = x_t @ w_ih.T + b_ih
        gh = h @ w_hh.T + b_hh
        i_r, i_z, i_n = gi[:, :H], gi[:, H:2 * H], gi[:, 2 * H:]
        h_r, h_z, h_n = gh[:, :H], gh[:, H:2 * H], gh[:, 2 * H:]
        r = jax.nn.sigmoid(i_r + h_r)
        z = jax.nn.sigmoid(i_z + h_z)
        n = jnp.tanh(i_n + r * h_n)
        h_new = (1.0 - z) * n + z * h
        return h_new, h_new

    x_tm = jnp.transpose(x, (1, 0, 2))
    h_T, hs = lax.scan(cell, h_0[0], x_tm)
    y = jnp.transpose(hs, (1, 0, 2)) @ w_fc.T + b_fc
    return y, h_T[None]


if __name__ == "__main__":
    key = jax.random.PRNGKey(0)
    kp, k1, k2, k3, k4 = jax.random.split(key, 5)
    params = init_params(kp)

    # Config 1: the small module-consistent shapes (B=2, T=8), single grid block.
    B, T = 2, 8
    x = jax.random.normal(k1, (B, T, POSITION_FEATURE_DIM), jnp.float32)
    h_0 = jax.random.normal(k2, (1, B, HIDDEN_STATE_SIZE), jnp.float32)

    out, h_T = position_embedding_network(x, h_0, params)
    out = jax.block_until_ready(out)
    h_T = jax.block_until_ready(h_T)

    assert out.shape == (B, T, OUTPUT_STATE_SIZE)
    assert h_T.shape == (1, B, HIDDEN_STATE_SIZE)
    ref_out, ref_hT = _reference_forward(x, h_0, params)
    assert jnp.allclose(out, ref_out, atol=1e-4, rtol=1e-4)
    assert jnp.allclose(h_T, ref_hT, atol=1e-4, rtol=1e-4)

    # Config 2: exercise the multi-block batch grid and the unroll=8 branch.
    B2, T2 = 16, 48
    x2 = jax.random.normal(k3, (B2, T2, POSITION_FEATURE_DIM), jnp.float32)
    h2 = jax.random.normal(k4, (1, B2, HIDDEN_STATE_SIZE), jnp.float32)

    out2, hT2 = position_embedding_network(x2, h2, params, num_batch_blocks=2)
    out2 = jax.block_until_ready(out2)
    hT2 = jax.block_until_ready(hT2)

    ref_out2, ref_hT2 = _reference_forward(x2, h2, params)
    assert out2.shape == (B2, T2, OUTPUT_STATE_SIZE)
    assert jnp.allclose(out2, ref_out2, atol=1e-4, rtol=1e-4)
    assert jnp.allclose(hT2, ref_hT2, atol=1e-4, rtol=1e-4)

    print("KERNEL_OK")
</pallas_src>

<mosaic_0001>
module attributes {stable_mosaic.version = 11 : i64} {
  func.func @_gru_fc_fused_kernel(%arg0: i32, %arg1: memref<8x8x29xf32, #tpu.memory_space<vmem>>, %arg2: memref<8x32xf32, #tpu.memory_space<vmem>>, %arg3: memref<29x96xf32, #tpu.memory_space<vmem>>, %arg4: memref<32x96xf32, #tpu.memory_space<vmem>>, %arg5: memref<1x96xf32, #tpu.memory_space<vmem>>, %arg6: memref<1x32xf32, #tpu.memory_space<vmem>>, %arg7: memref<32x2xf32, #tpu.memory_space<vmem>>, %arg8: memref<1x2xf32, #tpu.memory_space<vmem>>, %arg9: memref<8x8x2xf32, #tpu.memory_space<vmem>>, %arg10: memref<8x32xf32, #tpu.memory_space<vmem>>, %arg11: memref<8x8x96xf32, #tpu.memory_space<vmem>>, %arg12: memref<8x8x32xf32, #tpu.memory_space<vmem>>) attributes {dimension_semantics = [#tpu.dimension_semantics<parallel>], iteration_bounds = array<i64: 1>, scalar_prefetch = 0 : i64, scratch_operands = 2 : i64, tpu.core_type = #tpu.core_type<tc>, window_params = [{transform_indices = @transform_0, window_bounds = array<i64: 8, 8, 29>}, {transform_indices = @transform_1, window_bounds = array<i64: 8, 32>}, {pipeline_mode = #tpu.pipeline_mode<synchronous>, transform_indices = @transform_2, window_bounds = array<i64: 29, 96>}, {pipeline_mode = #tpu.pipeline_mode<synchronous>, transform_indices = @transform_3, window_bounds = array<i64: 32, 96>}, {pipeline_mode = #tpu.pipeline_mode<synchronous>, transform_indices = @transform_4, window_bounds = array<i64: 1, 96>}, {pipeline_mode = #tpu.pipeline_mode<synchronous>, transform_indices = @transform_5, window_bounds = array<i64: 1, 32>}, {pipeline_mode = #tpu.pipeline_mode<synchronous>, transform_indices = @transform_6, window_bounds = array<i64: 32, 2>}, {pipeline_mode = #tpu.pipeline_mode<synchronous>, transform_indices = @transform_7, window_bounds = array<i64: 1, 2>}, {transform_indices = @transform_8, window_bounds = array<i64: 8, 8, 2>}, {transform_indices = @transform_9, window_bounds = array<i64: 8, 32>}]} {
    %c0 = arith.constant 0 : index
    %c0_0 = arith.constant 0 : index
    %c0_1 = arith.constant 0 : index
    %0 = vector.load %arg1[%c0, %c0_0, %c0_1] : memref<8x8x29xf32, #tpu.memory_space<vmem>>, vector<8x8x29xf32>
    %1 = vector.shape_cast %0 : vector<8x8x29xf32> to vector<64x29xf32>
    %c0_2 = arith.constant 0 : index
    %c0_3 = arith.constant 0 : index
    %2 = vector.load %arg3[%c0_2, %c0_3] : memref<29x96xf32, #tpu.memory_space<vmem>>, vector<29x96xf32>
    %cst = arith.constant dense<0.000000e+00> : vector<64x96xf32>
    %3 = tpu.matmul %1, %2, %cst {dimension_numbers = #tpu.dot_dimension_numbers<[1], [0], [0], [1], [0, 0, 1, 1], [], []>} : vector<64x29xf32>, vector<29x96xf32>, vector<64x96xf32> -> vector<64x96xf32>
    %c0_4 = arith.constant 0 : index
    %c0_5 = arith.constant 0 : index
    %4 = vector.load %arg5[%c0_4, %c0_5] : memref<1x96xf32, #tpu.memory_space<vmem>>, vector<1x96xf32>
    %5 = vector.broadcast %4 : vector<1x96xf32> to vector<64x96xf32>
    %6 = arith.addf %3, %5 : vector<64x96xf32>
    %7 = vector.shape_cast %6 : vector<64x96xf32> to vector<8x8x96xf32>
    %c0_6 = arith.constant 0 : index
    %c0_7 = arith.constant 0 : index
    %c0_8 = arith.constant 0 : index
    %8 = vector.load %arg11[%c0_6, %c0_7, %c0_8] : memref<8x8x96xf32, #tpu.memory_space<vmem>>, vector<8x8x96xf32>
    tpu.vector_store %arg11[%c0_6, %c0_7, %c0_8], %7 {strides = array<i32>} : memref<8x8x96xf32, #tpu.memory_space<vmem>>, vector<8x8x96xf32>,
    %c0_9 = arith.constant 0 : index
    %c0_10 = arith.constant 0 : index
    %9 = vector.load %arg4[%c0_9, %c0_10] : memref<32x96xf32, #tpu.memory_space<vmem>>, vector<32x96xf32>
    %c0_11 = arith.constant 0 : index
    %c0_12 = arith.constant 0 : index
    %10 = vector.load %arg6[%c0_11, %c0_12] : memref<1x32xf32, #tpu.memory_space<vmem>>, vector<1x32xf32>
    %c0_13 = arith.constant 0 : index
    %c0_14 = arith.constant 0 : index
    %11 = vector.load %arg2[%c0_13, %c0_14] : memref<8x32xf32, #tpu.memory_space<vmem>>, vector<8x32xf32>
    %c0_i32 = arith.constant 0 : i32
    %12 = arith.index_cast %c0_i32 : i32 to index
    %c0_15 = arith.constant 0 : index
    %c0_16 = arith.constant 0 : index
    %13 = vector.load %arg11[%12, %c0_15, %c0_16] : memref<8x8x96xf32, #tpu.memory_space<vmem>>, vector<1x8x96xf32>
    %14 = vector.shape_cast %13 : vector<1x8x96xf32> to vector<8x96xf32>
    %cst_17 = arith.constant dense<0.000000e+00> : vector<8x96xf32>
    %15 = tpu.matmul %11, %9, %cst_17 {dimension_numbers = #tpu.dot_dimension_numbers<[1], [0], [0], [1], [0, 0, 1, 1], [], []>} : vector<8x32xf32>, vector<32x96xf32>, vector<8x96xf32> -> vector<8x96xf32>
    %16 = vector.extract_strided_slice %14 {offsets = [0, 0], sizes = [8, 64], strides = [1, 1]} : vector<8x96xf32> to vector<8x64xf32>
    %17 = vector.extract_strided_slice %15 {offsets = [0, 0], sizes = [8, 64], strides = [1, 1]} : vector<8x96xf32> to vector<8x64xf32>
    %18 = arith.addf %16, %17 : vector<8x64xf32>
    %19 = arith.negf %18 : vector<8x64xf32>
    %20 = math.exp %19 : vector<8x64xf32>
    %cst_18 = arith.constant 1.000000e+00 : f32
    %21 = vector.broadcast %cst_18 : f32 to vector<8x64xf32>
    %22 = arith.addf %21, %20 : vector<8x64xf32>
    %23 = arith.divf %21, %22 : vector<8x64xf32>
    %24 = vector.extract_strided_slice %23 {offsets = [0, 0], sizes = [8, 32], strides = [1, 1]} : vector<8x64xf32> to vector<8x32xf32>
    %25 = vector.extract_strided_slice %23 {offsets = [0, 32], sizes = [8, 32], strides = [1, 1]} : vector<8x64xf32> to vector<8x32xf32>
    %26 = vector.extract_strided_slice %14 {offsets = [0, 64], sizes = [8, 32], strides = [1, 1]} : vector<8x96xf32> to vector<8x32xf32>
    %27 = vector.extract_strided_slice %15 {offsets = [0, 64], sizes = [8, 32], strides = [1, 1]} : vector<8x96xf32> to vector<8x32xf32>
    %28 = vector.broadcast %10 : vector<1x32xf32> to vector<8x32xf32>
    %29 = arith.addf %27, %28 : vector<8x32xf32>
    %30 = arith.mulf %24, %29 : vector<8x32xf32>
    %31 = arith.addf %26, %30 : vector<8x32xf32>
    %32 = math.tanh %31 : vector<8x32xf32>
    %33 = arith.subf %11, %32 : vector<8x32xf32>
    %34 = arith.mulf %25, %33 : vector<8x32xf32>
    %35 = arith.addf %32, %34 : vector<8x32xf32>
    %36 = arith.index_cast %c0_i32 : i32 to index
    %c0_19 = arith.constant 0 : index
    %c0_20 = arith.constant 0 : index
    %37 = vector.load %arg12[%36, %c0_19, %c0_20] : memref<8x8x32xf32, #tpu.memory_space<vmem>>, vector<1x8x32xf32>
    %38 = vector.shape_cast %37 : vector<1x8x32xf32> to vector<8x32xf32>
    %39 = vector.shape_cast %35 : vector<8x32xf32> to vector<1x8x32xf32>
    tpu.vector_store %arg12[%36, %c0_19, %c0_20], %39 {strides = array<i32>} : memref<8x8x32xf32, #tpu.memory_space<vmem>>, vector<1x8x32xf32>,
    %c1_i32 = arith.constant 1 : i32
    %40 = arith.index_cast %c1_i32 : i32 to index
    %c0_21 = arith.constant 0 : index
    %c0_22 = arith.constant 0 : index
    %41 = vector.load %arg11[%40, %c0_21, %c0_22] : memref<8x8x96xf32, #tpu.memory_space<vmem>>, vector<1x8x96xf32>
    %42 = vector.shape_cast %41 : vector<1x8x96xf32> to vector<8x96xf32>
    %cst_23 = arith.constant dense<0.000000e+00> : vector<8x96xf32>
    %43 = tpu.matmul %35, %9, %cst_23 {dimension_numbers = #tpu.dot_dimension_numbers<[1], [0], [0], [1], [0, 0, 1, 1], [], []>} : vector<8x32xf32>, vector<32x96xf32>, vector<8x96xf32> -> vector<8x96xf32>
    %44 = vector.extract_strided_slice %42 {offsets = [0, 0], sizes = [8, 64], strides = [1, 1]} : vector<8x96xf32> to vector<8x64xf32>
    %45 = vector.extract_strided_slice %43 {offsets = [0, 0], sizes = [8, 64], strides = [1, 1]} : vector<8x96xf32> to vector<8x64xf32>
    %46 = arith.addf %44, %45 : vector<8x64xf32>
    %47 = arith.negf %46 : vector<8x64xf32>
    %48 = math.exp %47 : vector<8x64xf32>
    %cst_24 = arith.constant 1.000000e+00 : f32
    %49 = vector.broadcast %cst_24 : f32 to vector<8x64xf32>
    %50 = arith.addf %49, %48 : vector<8x64xf32>
    %51 = arith.divf %49, %50 : vector<8x64xf32>
    %52 = vector.extract_strided_slice %51 {offsets = [0, 0], sizes = [8, 32], strides = [1, 1]} : vector<8x64xf32> to vector<8x32xf32>
    %53 = vector.extract_strided_slice %51 {offsets = [0, 32], sizes = [8, 32], strides = [1, 1]} : vector<8x64xf32> to vector<8x32xf32>
    %54 = vector.extract_strided_slice %42 {offsets = [0, 64], sizes = [8, 32], strides = [1, 1]} : vector<8x96xf32> to vector<8x32xf32>
    %55 = vector.extract_strided_slice %43 {offsets = [0, 64], sizes = [8, 32], strides = [1, 1]} : vector<8x96xf32> to vector<8x32xf32>
    %56 = vector.broadcast %10 : vector<1x32xf32> to vector<8x32xf32>
    %57 = arith.addf %55, %56 : vector<8x32xf32>
    %58 = arith.mulf %52, %57 : vector<8x32xf32>
    %59 = arith.addf %54, %58 : vector<8x32xf32>
    %60 = math.tanh %59 : vector<8x32xf32>
    %61 = arith.subf %35, %60 : vector<8x32xf32>
    %62 = arith.mulf %53, %61 : vector<8x32xf32>
    %63 = arith.addf %60, %62 : vector<8x32xf32>
    %64 = arith.index_cast %c1_i32 : i32 to index
    %c0_25 = arith.constant 0 : index
    %c0_26 = arith.constant 0 : index
    %65 = vector.load %arg12[%64, %c0_25, %c0_26] : memref<8x8x32xf32, #tpu.memory_space<vmem>>, vector<1x8x32xf32>
    %66 = vector.shape_cast %65 : vector<1x8x32xf32> to vector<8x32xf32>
    %67 = vector.shape_cast %63 : vector<8x32xf32> to vector<1x8x32xf32>
    tpu.vector_store %arg12[%64, %c0_25, %c0_26], %67 {strides = array<i32>} : memref<8x8x32xf32, #tpu.memory_space<vmem>>, vector<1x8x32xf32>,
    %c2_i32 = arith.constant 2 : i32
    %68 = arith.index_cast %c2_i32 : i32 to index
    %c0_27 = arith.constant 0 : index
    %c0_28 = arith.constant 0 : index
    %69 = vector.load %arg11[%68, %c0_27, %c0_28] : memref<8x8x96xf32, #tpu.memory_space<vmem>>, vector<1x8x96xf32>
    %70 = vector.shape_cast %69 : vector<1x8x96xf32> to vector<8x96xf32>
    %cst_29 = arith.constant dense<0.000000e+00> : vector<8x96xf32>
    %71 = tpu.matmul %63, %9, %cst_29 {dimension_numbers = #tpu.dot_dimension_numbers<[1], [0], [0], [1], [0, 0, 1, 1], [], []>} : vector<8x32xf32>, vector<32x96xf32>, vector<8x96xf32> -> vector<8x96xf32>
    %72 = vector.extract_strided_slice %70 {offsets = [0, 0], sizes = [8, 64], strides = [1, 1]} : vector<8x96xf32> to vector<8x64xf32>
    %73 = vector.extract_strided_slice %71 {offsets = [0, 0], sizes = [8, 64], strides = [1, 1]} : vector<8x96xf32> to vector<8x64xf32>
    %74 = arith.addf %72, %73 : vector<8x64xf32>
    %75 = arith.negf %74 : vector<8x64xf32>
    %76 = math.exp %75 : vector<8x64xf32>
    %cst_30 = arith.constant 1.000000e+00 : f32
    %77 = vector.broadcast %cst_30 : f32 to vector<8x64xf32>
    %78 = arith.addf %77, %76 : vector<8x64xf32>
    %79 = arith.divf %77, %78 : vector<8x64xf32>
    %80 = vector.extract_strided_slice %79 {offsets = [0, 0], sizes = [8, 32], strides = [1, 1]} : vector<8x64xf32> to vector<8x32xf32>
    %81 = vector.extract_strided_slice %79 {offsets = [0, 32], sizes = [8, 32], strides = [1, 1]} : vector<8x64xf32> to vector<8x32xf32>
    %82 = vector.extract_strided_slice %70 {offsets = [0, 64], sizes = [8, 32], strides = [1, 1]} : vector<8x96xf32> to vector<8x32xf32>
    %83 = vector.extract_strided_slice %71 {offsets = [0, 64], sizes = [8, 32], strides = [1, 1]} : vector<8x96xf32> to vector<8x32xf32>
    %84 = vector.broadcast %10 : vector<1x32xf32> to vector<8x32xf32>
    %85 = arith.addf %83, %84 : vector<8x32xf32>
    %86 = arith.mulf %80, %85 : vector<8x32xf32>
    %87 = arith.addf %82, %86 : vector<8x32xf32>
    %88 = math.tanh %87 : vector<8x32xf32>
    %89 = arith.subf %63, %88 : vector<8x32xf32>
    %90 = arith.mulf %81, %89 : vector<8x32xf32>
    %91 = arith.addf %88, %90 : vector<8x32xf32>
    %92 = arith.index_cast %c2_i32 : i32 to index
    %c0_31 = arith.constant 0 : index
    %c0_32 = arith.constant 0 : index
    %93 = vector.load %arg12[%92, %c0_31, %c0_32] : memref<8x8x32xf32, #tpu.memory_space<vmem>>, vector<1x8x32xf32>
    %94 = vector.shape_cast %93 : vector<1x8x32xf32> to vector<8x32xf32>
    %95 = vector.shape_cast %91 : vector<8x32xf32> to vector<1x8x32xf32>
    tpu.vector_store %arg12[%92, %c0_31, %c0_32], %95 {strides = array<i32>} : memref<8x8x32xf32, #tpu.memory_space<vmem>>, vector<1x8x32xf32>,
    %c3_i32 = arith.constant 3 : i32
    %96 = arith.index_cast %c3_i32 : i32 to index
    %c0_33 = arith.constant 0 : index
    %c0_34 = arith.constant 0 : index
    %97 = vector.load %arg11[%96, %c0_33, %c0_34] : memref<8x8x96xf32, #tpu.memory_space<vmem>>, vector<1x8x96xf32>
    %98 = vector.shape_cast %97 : vector<1x8x96xf32> to vector<8x96xf32>
    %cst_35 = arith.constant dense<0.000000e+00> : vector<8x96xf32>
    %99 = tpu.matmul %91, %9, %cst_35 {dimension_numbers = #tpu.dot_dimension_numbers<[1], [0], [0], [1], [0, 0, 1, 1], [], []>} : vector<8x32xf32>, vector<32x96xf32>, vector<8x96xf32> -> vector<8x96xf32>
    %100 = vector.extract_strided_slice %98 {offsets = [0, 0], sizes = [8, 64], strides = [1, 1]} : vector<8x96xf32> to vector<8x64xf32>
    %101 = vector.extract_strided_slice %99 {offsets = [0, 0], sizes = [8, 64], strides = [1, 1]} : vector<8x96xf32> to vector<8x64xf32>
    %102 = arith.addf %100, %101 : vector<8x64xf32>
    %103 = arith.negf %102 : vector<8x64xf32>
    %104 = math.exp %103 : vector<8x64xf32>
    %cst_36 = arith.constant 1.000000e+00 : f32
    %105 = vector.broadcast %cst_36 : f32 to vector<8x64xf32>
    %106 = arith.addf %105, %104 : vector<8x64xf32>
    %107 = arith.divf %105, %106 : vector<8x64xf32>
    %108 = vector.extract_strided_slice %107 {offsets = [0, 0], sizes = [8, 32], strides = [1, 1]} : vector<8x64xf32> to vector<8x32xf32>
    %109 = vector.extract_strided_slice %107 {offsets = [0, 32], sizes = [8, 32], strides = [1, 1]} : vector<8x64xf32> to vector<8x32xf32>
    %110 = vector.extract_strided_slice %98 {offsets = [0, 64], sizes = [8, 32], strides = [1, 1]} : vector<8x96xf32> to vector<8x32xf32>
    %111 = vector.extract_strided_slice %99 {offsets = [0, 64], sizes = [8, 32], strides = [1, 1]} : vector<8x96xf32> to vector<8x32xf32>
    %112 = vector.broadcast %10 : vector<1x32xf32> to vector<8x32xf32>
    %113 = arith.addf %111, %112 : vector<8x32xf32>
    %114 = arith.mulf %108, %113 : vector<8x32xf32>
    %115 = arith.addf %110, %114 : vector<8x32xf32>
    %116 = math.tanh %115 : vector<8x32xf32>
    %117 = arith.subf %91, %116 : vector<8x32xf32>
    %118 = arith.mulf %109, %117 : vector<8x32xf32>
    %119 = arith.addf %116, %118 : vector<8x32xf32>
    %120 = arith.index_cast %c3_i32 : i32 to index
    %c0_37 = arith.constant 0 : index
    %c0_38 = arith.constant 0 : index
    %121 = vector.load %arg12[%120, %c0_37, %c0_38] : memref<8x8x32xf32, #tpu.memory_space<vmem>>, vector<1x8x32xf32>
    %122 = vector.shape_cast %121 : vector<1x8x32xf32> to vector<8x32xf32>
    %123 = vector.shape_cast %119 : vector<8x32xf32> to vector<1x8x32xf32>
    tpu.vector_store %arg12[%120, %c0_37, %c0_38], %123 {strides = array<i32>} : memref<8x8x32xf32, #tpu.memory_space<vmem>>, vector<1x8x32xf32>,
    %c4_i32 = arith.constant 4 : i32
    %124 = arith.index_cast %c4_i32 : i32 to index
    %c0_39 = arith.constant 0 : index
    %c0_40 = arith.constant 0 : index
    %125 = vector.load %arg11[%124, %c0_39, %c0_40] : memref<8x8x96xf32, #tpu.memory_space<vmem>>, vector<1x8x96xf32>
    %126 = vector.shape_cast %125 : vector<1x8x96xf32> to vector<8x96xf32>
    %cst_41 = arith.constant dense<0.000000e+00> : vector<8x96xf32>
    %127 = tpu.matmul %119, %9, %cst_41 {dimension_numbers = #tpu.dot_dimension_numbers<[1], [0], [0], [1], [0, 0, 1, 1], [], []>} : vector<8x32xf32>, vector<32x96xf32>, vector<8x96xf32> -> vector<8x96xf32>
    %128 = vector.extract_strided_slice %126 {offsets = [0, 0], sizes = [8, 64], strides = [1, 1]} : vector<8x96xf32> to vector<8x64xf32>
    %129 = vector.extract_strided_slice %127 {offsets = [0, 0], sizes = [8, 64], strides = [1, 1]} : vector<8x96xf32> to vector<8x64xf32>
    %130 = arith.addf %128, %129 : vector<8x64xf32>
    %131 = arith.negf %130 : vector<8x64xf32>
    %132 = math.exp %131 : vector<8x64xf32>
    %cst_42 = arith.constant 1.000000e+00 : f32
    %133 = vector.broadcast %cst_42 : f32 to vector<8x64xf32>
    %134 = arith.addf %133, %132 : vector<8x64xf32>
    %135 = arith.divf %133, %134 : vector<8x64xf32>
    %136 = vector.extract_strided_slice %135 {offsets = [0, 0], sizes = [8, 32], strides = [1, 1]} : vector<8x64xf32> to vector<8x32xf32>
    %137 = vector.extract_strided_slice %135 {offsets = [0, 32], sizes = [8, 32], strides = [1, 1]} : vector<8x64xf32> to vector<8x32xf32>
    %138 = vector.extract_strided_slice %126 {offsets = [0, 64], sizes = [8, 32], strides = [1, 1]} : vector<8x96xf32> to vector<8x32xf32>
    %139 = vector.extract_strided_slice %127 {offsets = [0, 64], sizes = [8, 32], strides = [1, 1]} : vector<8x96xf32> to vector<8x32xf32>
    %140 = vector.broadcast %10 : vector<1x32xf32> to vector<8x32xf32>
    %141 = arith.addf %139, %140 : vector<8x32xf32>
    %142 = arith.mulf %136, %141 : vector<8x32xf32>
    %143 = arith.addf %138, %142 : vector<8x32xf32>
    %144 = math.tanh %143 : vector<8x32xf32>
    %145 = arith.subf %119, %144 : vector<8x32xf32>
    %146 = arith.mulf %137, %145 : vector<8x32xf32>
    %147 = arith.addf %144, %146 : vector<8x32xf32>
    %148 = arith.index_cast %c4_i32 : i32 to index
    %c0_43 = arith.constant 0 : index
    %c0_44 = arith.constant 0 : index
    %149 = vector.load %arg12[%148, %c0_43, %c0_44] : memref<8x8x32xf32, #tpu.memory_space<vmem>>, vector<1x8x32xf32>
    %150 = vector.shape_cast %149 : vector<1x8x32xf32> to vector<8x32xf32>
    %151 = vector.shape_cast %147 : vector<8x32xf32> to vector<1x8x32xf32>
    tpu.vector_store %arg12[%148, %c0_43, %c0_44], %151 {strides = array<i32>} : memref<8x8x32xf32, #tpu.memory_space<vmem>>, vector<1x8x32xf32>,
    %c5_i32 = arith.constant 5 : i32
    %152 = arith.index_cast %c5_i32 : i32 to index
    %c0_45 = arith.constant 0 : index
    %c0_46 = arith.constant 0 : index
    %153 = vector.load %arg11[%152, %c0_45, %c0_46] : memref<8x8x96xf32, #tpu.memory_space<vmem>>, vector<1x8x96xf32>
    %154 = vector.shape_cast %153 : vector<1x8x96xf32> to vector<8x96xf32>
    %cst_47 = arith.constant dense<0.000000e+00> : vector<8x96xf32>
    %155 = tpu.matmul %147, %9, %cst_47 {dimension_numbers = #tpu.dot_dimension_numbers<[1], [0], [0], [1], [0, 0, 1, 1], [], []>} : vector<8x32xf32>, vector<32x96xf32>, vector<8x96xf32> -> vector<8x96xf32>
    %156 = vector.extract_strided_slice %154 {offsets = [0, 0], sizes = [8, 64], strides = [1, 1]} : vector<8x96xf32> to vector<8x64xf32>
    %157 = vector.extract_strided_slice %155 {offsets = [0, 0], sizes = [8, 64], strides = [1, 1]} : vector<8x96xf32> to vector<8x64xf32>
    %158 = arith.addf %156, %157 : vector<8x64xf32>
    %159 = arith.negf %158 : vector<8x64xf32>
    %160 = math.exp %159 : vector<8x64xf32>
    %cst_48 = arith.constant 1.000000e+00 : f32
    %161 = vector.broadcast %cst_48 : f32 to vector<8x64xf32>
    %162 = arith.addf %161, %160 : vector<8x64xf32>
    %163 = arith.divf %161, %162 : vector<8x64xf32>
    %164 = vector.extract_strided_slice %163 {offsets = [0, 0], sizes = [8, 32], strides = [1, 1]} : vector<8x64xf32> to vector<8x32xf32>
    %165 = vector.extract_strided_slice %163 {offsets = [0, 32], sizes = [8, 32], strides = [1, 1]} : vector<8x64xf32> to vector<8x32xf32>
    %166 = vector.extract_strided_slice %154 {offsets = [0, 64], sizes = [8, 32], strides = [1, 1]} : vector<8x96xf32> to vector<8x32xf32>
    %167 = vector.extract_strided_slice %155 {offsets = [0, 64], sizes = [8, 32], strides = [1, 1]} : vector<8x96xf32> to vector<8x32xf32>
    %168 = vector.broadcast %10 : vector<1x32xf32> to vector<8x32xf32>
    %169 = arith.addf %167, %168 : vector<8x32xf32>
    %170 = arith.mulf %164, %169 : vector<8x32xf32>
    %171 = arith.addf %166, %170 : vector<8x32xf32>
    %172 = math.tanh %171 : vector<8x32xf32>
    %173 = arith.subf %147, %172 : vector<8x32xf32>
    %174 = arith.mulf %165, %173 : vector<8x32xf32>
    %175 = arith.addf %172, %174 : vector<8x32xf32>
    %176 = arith.index_cast %c5_i32 : i32 to index
    %c0_49 = arith.constant 0 : index
    %c0_50 = arith.constant 0 : index
    %177 = vector.load %arg12[%176, %c0_49, %c0_50] : memref<8x8x32xf32, #tpu.memory_space<vmem>>, vector<1x8x32xf32>
    %178 = vector.shape_cast %177 : vector<1x8x32xf32> to vector<8x32xf32>
    %179 = vector.shape_cast %175 : vector<8x32xf32> to vector<1x8x32xf32>
    tpu.vector_store %arg12[%176, %c0_49, %c0_50], %179 {strides = array<i32>} : memref<8x8x32xf32, #tpu.memory_space<vmem>>, vector<1x8x32xf32>,
    %c6_i32 = arith.constant 6 : i32
    %180 = arith.index_cast %c6_i32 : i32 to index
    %c0_51 = arith.constant 0 : index
    %c0_52 = arith.constant 0 : index
    %181 = vector.load %arg11[%180, %c0_51, %c0_52] : memref<8x8x96xf32, #tpu.memory_space<vmem>>, vector<1x8x96xf32>
    %182 = vector.shape_cast %181 : vector<1x8x96xf32> to vector<8x96xf32>
    %cst_53 = arith.constant dense<0.000000e+00> : vector<8x96xf32>
    %183 = tpu.matmul %175, %9, %cst_53 {dimension_numbers = #tpu.dot_dimension_numbers<[1], [0], [0], [1], [0, 0, 1, 1], [], []>} : vector<8x32xf32>, vector<32x96xf32>, vector<8x96xf32> -> vector<8x96xf32>
    %184 = vector.extract_strided_slice %182 {offsets = [0, 0], sizes = [8, 64], strides = [1, 1]} : vector<8x96xf32> to vector<8x64xf32>
    %185 = vector.extract_strided_slice %183 {offsets = [0, 0], sizes = [8, 64], strides = [1, 1]} : vector<8x96xf32> to vector<8x64xf32>
    %186 = arith.addf %184, %185 : vector<8x64xf32>
    %187 = arith.negf %186 : vector<8x64xf32>
    %188 = math.exp %187 : vector<8x64xf32>
    %cst_54 = arith.constant 1.000000e+00 : f32
    %189 = vector.broadcast %cst_54 : f32 to vector<8x64xf32>
    %190 = arith.addf %189, %188 : vector<8x64xf32>
    %191 = arith.divf %189, %190 : vector<8x64xf32>
    %192 = vector.extract_strided_slice %191 {offsets = [0, 0], sizes = [8, 32], strides = [1, 1]} : vector<8x64xf32> to vector<8x32xf32>
    %193 = vector.extract_strided_slice %191 {offsets = [0, 32], sizes = [8, 32], strides = [1, 1]} : vector<8x64xf32> to vector<8x32xf32>
    %194 = vector.extract_strided_slice %182 {offsets = [0, 64], sizes = [8, 32], strides = [1, 1]} : vector<8x96xf32> to vector<8x32xf32>
    %195 = vector.extract_strided_slice %183 {offsets = [0, 64], sizes = [8, 32], strides = [1, 1]} : vector<8x96xf32> to vector<8x32xf32>
    %196 = vector.broadcast %10 : vector<1x32xf32> to vector<8x32xf32>
    %197 = arith.addf %195, %196 : vector<8x32xf32>
    %198 = arith.mulf %192, %197 : vector<8x32xf32>
    %199 = arith.addf %194, %198 : vector<8x32xf32>
    %200 = math.tanh %199 : vector<8x32xf32>
    %201 = arith.subf %175, %200 : vector<8x32xf32>
    %202 = arith.mulf %193, %201 : vector<8x32xf32>
    %203 = arith.addf %200, %202 : vector<8x32xf32>
    %204 = arith.index_cast %c6_i32 : i32 to index
    %c0_55 = arith.constant 0 : index
    %c0_56 = arith.constant 0 : index
    %205 = vector.load %arg12[%204, %c0_55, %c0_56] : memref<8x8x32xf32, #tpu.memory_space<vmem>>, vector<1x8x32xf32>
    %206 = vector.shape_cast %205 : vector<1x8x32xf32> to vector<8x32xf32>
    %207 = vector.shape_cast %203 : vector<8x32xf32> to vector<1x8x32xf32>
    tpu.vector_store %arg12[%204, %c0_55, %c0_56], %207 {strides = array<i32>} : memref<8x8x32xf32, #tpu.memory_space<vmem>>, vector<1x8x32xf32>,
    %c7_i32 = arith.constant 7 : i32
    %208 = arith.index_cast %c7_i32 : i32 to index
    %c0_57 = arith.constant 0 : index
    %c0_58 = arith.constant 0 : index
    %209 = vector.load %arg11[%208, %c0_57, %c0_58] : memref<8x8x96xf32, #tpu.memory_space<vmem>>, vector<1x8x96xf32>
    %210 = vector.shape_cast %209 : vector<1x8x96xf32> to vector<8x96xf32>
    %cst_59 = arith.constant dense<0.000000e+00> : vector<8x96xf32>
    %211 = tpu.matmul %203, %9, %cst_59 {dimension_numbers = #tpu.dot_dimension_numbers<[1], [0], [0], [1], [0, 0, 1, 1], [], []>} : vector<8x32xf32>, vector<32x96xf32>, vector<8x96xf32> -> vector<8x96xf32>
    %212 = vector.extract_strided_slice %210 {offsets = [0, 0], sizes = [8, 64], strides = [1, 1]} : vector<8x96xf32> to vector<8x64xf32>
    %213 = vector.extract_strided_slice %211 {offsets = [0, 0], sizes = [8, 64], strides = [1, 1]} : vector<8x96xf32> to vector<8x64xf32>
    %214 = arith.addf %212, %213 : vector<8x64xf32>
    %215 = arith.negf %214 : vector<8x64xf32>
    %216 = math.exp %215 : vector<8x64xf32>
    %cst_60 = arith.constant 1.000000e+00 : f32
    %217 = vector.broadcast %cst_60 : f32 to vector<8x64xf32>
    %218 = arith.addf %217, %216 : vector<8x64xf32>
    %219 = arith.divf %217, %218 : vector<8x64xf32>
    %220 = vector.extract_strided_slice %219 {offsets = [0, 0], sizes = [8, 32], strides = [1, 1]} : vector<8x64xf32> to vector<8x32xf32>
    %221 = vector.extract_strided_slice %219 {offsets = [0, 32], sizes = [8, 32], strides = [1, 1]} : vector<8x64xf32> to vector<8x32xf32>
    %222 = vector.extract_strided_slice %210 {offsets = [0, 64], sizes = [8, 32], strides = [1, 1]} : vector<8x96xf32> to vector<8x32xf32>
    %223 = vector.extract_strided_slice %211 {offsets = [0, 64], sizes = [8, 32], strides = [1, 1]} : vector<8x96xf32> to vector<8x32xf32>
    %224 = vector.broadcast %10 : vector<1x32xf32> to vector<8x32xf32>
    %225 = arith.addf %223, %224 : vector<8x32xf32>
    %226 = arith.mulf %220, %225 : vector<8x32xf32>
    %227 = arith.addf %222, %226 : vector<8x32xf32>
    %228 = math.tanh %227 : vector<8x32xf32>
    %229 = arith.subf %203, %228 : vector<8x32xf32>
    %230 = arith.mulf %221, %229 : vector<8x32xf32>
    %231 = arith.addf %228, %230 : vector<8x32xf32>
    %232 = arith.index_cast %c7_i32 : i32 to index
    %c0_61 = arith.constant 0 : index
    %c0_62 = arith.constant 0 : index
    %233 = vector.load %arg12[%232, %c0_61, %c0_62] : memref<8x8x32xf32, #tpu.memory_space<vmem>>, vector<1x8x32xf32>
    %234 = vector.shape_cast %233 : vector<1x8x32xf32> to vector<8x32xf32>
    %235 = vector.shape_cast %231 : vector<8x32xf32> to vector<1x8x32xf32>
    tpu.vector_store %arg12[%232, %c0_61, %c0_62], %235 {strides = array<i32>} : memref<8x8x32xf32, #tpu.memory_space<vmem>>, vector<1x8x32xf32>,
    %c8_i32 = arith.constant 8 : i32
    %c0_63 = arith.constant 0 : index
    %c0_64 = arith.constant 0 : index
    %236 = vector.load %arg10[%c0_63, %c0_64] : memref<8x32xf32, #tpu.memory_space<vmem>>, vector<8x32xf32>
    tpu.vector_store %arg10[%c0_63, %c0_64], %231 {strides = array<i32>} : memref<8x32xf32, #tpu.memory_space<vmem>>, vector<8x32xf32>,
    %c0_65 = arith.constant 0 : index
    %c0_66 = arith.constant 0 : index
    %c0_67 = arith.constant 0 : index
    %237 = vector.load %arg12[%c0_65, %c0_66, %c0_67] : memref<8x8x32xf32, #tpu.memory_space<vmem>>, vector<8x8x32xf32>
    %238 = vector.shape_cast %237 : vector<8x8x32xf32> to vector<64x32xf32>
    %c0_68 = arith.constant 0 : index
    %c0_69 = arith.constant 0 : index
    %239 = vector.load %arg7[%c0_68, %c0_69] : memref<32x2xf32, #tpu.memory_space<vmem>>, vector<32x2xf32>
    %cst_70 = arith.constant dense<0.000000e+00> : vector<64x2xf32>
    %240 = tpu.matmul %238, %239, %cst_70 {dimension_numbers = #tpu.dot_dimension_numbers<[1], [0], [0], [1], [0, 0, 1, 1], [], []>} : vector<64x32xf32>, vector<32x2xf32>, vector<64x2xf32> -> vector<64x2xf32>
    %c0_71 = arith.constant 0 : index
    %c0_72 = arith.constant 0 : index
    %241 = vector.load %arg8[%c0_71, %c0_72] : memref<1x2xf32, #tpu.memory_space<vmem>>, vector<1x2xf32>
    %242 = vector.broadcast %241 : vector<1x2xf32> to vector<64x2xf32>
    %243 = arith.addf %240, %242 : vector<64x2xf32>
    %244 = vector.shape_cast %243 : vector<64x2xf32> to vector<8x8x2xf32>
    %c0_73 = arith.constant 0 : index
    %c0_74 = arith.constant 0 : index
    %c0_75 = arith.constant 0 : index
    %245 = vector.load %arg9[%c0_73, %c0_74, %c0_75] : memref<8x8x2xf32, #tpu.memory_space<vmem>>, vector<8x8x2xf32>
    tpu.vector_store %arg9[%c0_73, %c0_74, %c0_75], %244 {strides = array<i32>} : memref<8x8x2xf32, #tpu.memory_space<vmem>>, vector<8x8x2xf32>,
    return
  }
  func.func @transform_0(%arg0: i32) -> (i32, i32, i32) {
    %c0_i32 = arith.constant 0 : i32
    %c0_i32_0 = arith.constant 0 : i32
    %c0_i32_1 = arith.constant 0 : i32
    return %c0_i32, %arg0, %c0_i32_0 : i32, i32, i32
  }
  func.func @transform_1(%arg0: i32) -> (i32, i32) {
    %c0_i32 = arith.constant 0 : i32
    %c0_i32_0 = arith.constant 0 : i32
    return %arg0, %c0_i32 : i32, i32
  }
  func.func @transform_2(%arg0: i32) -> (i32, i32) {
    %c0_i32 = arith.constant 0 : i32
    %c0_i32_0 = arith.constant 0 : i32
    %c0_i32_1 = arith.constant 0 : i32
    return %c0_i32, %c0_i32_0 : i32, i32
  }
  func.func @transform_3(%arg0: i32) -> (i32, i32) {
    %c0_i32 = arith.constant 0 : i32
    %c0_i32_0 = arith.constant 0 : i32
    %c0_i32_1 = arith.constant 0 : i32
    return %c0_i32, %c0_i32_0 : i32, i32
  }
  func.func @transform_4(%arg0: i32) -> (i32, i32) {
    %c0_i32 = arith.constant 0 : i32
    %c0_i32_0 = arith.constant 0 : i32
    %c0_i32_1 = arith.constant 0 : i32
    return %c0_i32, %c0_i32_0 : i32, i32
  }
  func.func @transform_5(%arg0: i32) -> (i32, i32) {
    %c0_i32 = arith.constant 0 : i32
    %c0_i32_0 = arith.constant 0 : i32
    %c0_i32_1 = arith.constant 0 : i32
    return %c0_i32, %c0_i32_0 : i32, i32
  }
  func.func @transform_6(%arg0: i32) -> (i32, i32) {
    %c0_i32 = arith.constant 0 : i32
    %c0_i32_0 = arith.constant 0 : i32
    %c0_i32_1 = arith.constant 0 : i32
    return %c0_i32, %c0_i32_0 : i32, i32
  }
  func.func @transform_7(%arg0: i32) -> (i32, i32) {
    %c0_i32 = arith.constant 0 : i32
    %c0_i32_0 = arith.constant 0 : i32
    %c0_i32_1 = arith.constant 0 : i32
    return %c0_i32, %c0_i32_0 : i32, i32
  }
  func.func @transform_8(%arg0: i32) -> (i32, i32, i32) {
    %c0_i32 = arith.constant 0 : i32
    %c0_i32_0 = arith.constant 0 : i32
    %c0_i32_1 = arith.constant 0 : i32
    return %c0_i32, %arg0, %c0_i32_0 : i32, i32, i32
  }
  func.func @transform_9(%arg0: i32) -> (i32, i32) {
    %c0_i32 = arith.constant 0 : i32
    %c0_i32_0 = arith.constant 0 : i32
    return %arg0, %c0_i32 : i32, i32
  }
}

</mosaic_0001>

<bundles_post_ra>
// kernel: position_embedding_network.1
= control target key start
LH: loop header
LB: loop body
LE: loop exit
PB: predicated region body
PF: predicated region fallthrough
CT: control target
= control target key end

     0   :  { %vm75_vm0 = vcmask 1044480   ;;  %vm50_vm1 = vcmask 236544   ;;  %v1546_v11 = vmov 0.0   ;;  %vm1548_vm2 = vmmov 0   ;;  %s1550_s19 = smov 96   ;;  %s1917_s2 = inlined_call_operand.vmem [shape: f32[29,96], index: 2, kind: input, shape index: {}]   ;;  %s1918_s0 = inlined_call_operand.vmem [shape: f32[8,8,29], index: 0, kind: input, shape index: {}]   ;;  %s1919_s3 = inlined_call_operand.vmem [shape: f32[32,96], index: 3, kind: input, shape index: {}]   ;;  %s1920_s5 = inlined_call_operand.vmem [shape: f32[1,32], index: 5, kind: input, shape index: {}]   ;;  %s1921_s1 = inlined_call_operand.vmem [shape: f32[8,32], index: 1, kind: input, shape index: {}]   ;;  %s1922_s4 = inlined_call_operand.vmem [shape: f32[1,96], index: 4, kind: input, shape index: {}]   ;;  %s1923_s6 = inlined_call_operand.vmem [shape: f32[32,2], index: 6, kind: input, shape index: {}]   ;;  %s1924_s7 = inlined_call_operand.vmem [shape: f32[1,2], index: 7, kind: input, shape index: {}]   ;;  %s1925_s8 = inlined_call_operand.vmem [shape: f32[8,8,2], index: 8, kind: output, shape index: {0}]   ;;  %s1926_s9 = inlined_call_operand.vmem [shape: f32[8,32], index: 9, kind: output, shape index: {1}]  }
   0x1   :  { %v42_v0 = vld [vmem:[%s1917_s2 + $0x18] sm:$0x1f]  ;;  %v41_v1 = vld [vmem:[%s1917_s2 + $0x10] sm:$0xff]  ;;  %v40_v2 = vld [vmem:[%s1917_s2 + $0x8] sm:$0xff]  ;;  %vm200_vm3 = vcmask 261120   ;;  %vm184_vm4 = vcmask 785408  }
   0x2   :  { %1357 = vmatprep.subr.msk.mxu0 %vm75_vm0, %v42_v0  ;;  %1485 = vmatprep.subr.msk.mxu1 %vm75_vm0, %v42_v0  ;;  %v39_v3 = vld [vmem:[%s1917_s2] sm:$0xff]  ;;  %v32_v6 = vld [vmem:[%s1918_s0 + $0x8] sm:$0xff]  ;;  %v37_v8 = vld [vmem:[%s1918_s0 + $0x30] sm:$0xff]  ;;  %vm1240_vm5 = vcmask 15360  }
   0x3   :  { %1358 = vmatpush3.msk.msra.mxu0 %vm75_vm0, %v42_v0  ;;  %1489 = vmatpush3.msk.msra.mxu1 %vm75_vm0, %v42_v0  ;;  %v31_v4 = vld [vmem:[%s1918_s0] sm:$0xff]  ;;  %v36_v7 = vld [vmem:[%s1918_s0 + $0x28] sm:$0xff]  ;;  %v1633_v9 = vld [vmem:[%s1919_s3 + $0x18] sm:$0xff] }
   0x4   :  { %1359 = vmatprep.subr.mxu0 %v41_v1  ;;  %1486 = vmatprep.subr.mxu1 %v41_v1  ;;  %v35_v5 = vld [vmem:[%s1918_s0 + $0x20] sm:$0xff]  ;;  %v1645_v12 = vld [vmem:[%s1919_s3 + $0x10] sm:$0xff]  ;;  %v38_v13 = vld [vmem:[%s1918_s0 + $0x38] sm:$0xff] }
   0x5   :  { %1360 = vmatpush3.msra.mxu0 %v41_v1  ;;  %1490 = vmatpush3.msra.mxu1 %v41_v1  ;;  %v1269_v10 = vld [vmem:[%s1920_s5] ss:$0 sm:$0xff]  ;;  %s1547_s5 = smov 64   ;;  %v1656_v14 = vld [vmem:[%s1919_s3 + $0x8] sm:$0xff] }
   0x6   :  { %1361 = vmatprep.subr.mxu0 %v40_v2  ;;  %1487 = vmatprep.subr.mxu1 %v40_v2  ;;  %v1666_v15 = vld [vmem:[%s1919_s3] sm:$0xff] }
   0x7   :  { %1362 = vmatpush3.msra.mxu0 %v40_v2  ;;  %1491 = vmatpush3.msra.mxu1 %v40_v2  ;;  %v1674_v16 = vld [vmem:[%s1921_s1] sm:$0xff] }
   0x8   :  { %1363 = vmatprep.subr.mxu0 %v39_v3  ;;  %1488 = vmatprep.subr.mxu1 %v39_v3  ;;  %v1701_v17 = vld [vmem:[%s1922_s4] ss:$0 sm:$0xff]  ;;  %s1549_s4 = smov 32  }
   0x9   :  { %1364 = vmatpush3.msra.mxu0 %v39_v3  ;;  %1492 = vmatpush3.msra.mxu1 %v39_v3  ;;  %v33_v3 = vld [vmem:[%s1918_s0 + $0x10] sm:$0xff] }
   0xa   :  { %1365 = vmatprep.mubr.msk.f32.mxu0 %vm50_vm1, %v31_v4  ;;  %1371 = vmatprep.mubr.msk.f32.mxu1 %vm50_vm1, %v35_v5  ;;  %v34_v4 = vld [vmem:[%s1918_s0 + $0x18] sm:$0xff] }
   0xb   :  { %1366 = vmatmul.mubr.msk.f32.vlgmr.msra.gmra.mxu0 %vm50_vm1, %v32_v6  ;;  %1372 = vmatmul.mubr.msk.f32.vlgmr.msra.gmra.mxu1 %vm50_vm1, %v36_v7 }
   0xc   :  { %1377 = vmatprep.subr.mxu1 %v1546_v11  ;;  %1374 = vmatprep.mubr.msk.f32.mxu1 %vm50_vm1, %v37_v8 }
   0xd   :  { %1378 = vmatpush3.msra.mxu1 %v1633_v9  ;;  %286 = vrot.lane.b32.xlu0 %v1269_v10, %s1547_s5 }
   0xe   :  { %1379 = vmatprep.subr.mxu1 %v1546_v11  ;;  %1399 = vmatprep.subr.mxu0 %v1546_v11 }
   0xf   :  { %1380 = vmatpush3.msra.mxu1 %v1645_v12  ;;  %1400 = vmatpush3.msra.mxu0 %v1633_v9 }
  0x10   :  { %1375 = vmatmul.mubr.msk.f32.gmra.mxu1 %vm50_vm1, %v38_v13  ;;  %1381 = vmatprep.subr.mxu1 %v1546_v11 }
  0x11   :  { %1382 = vmatpush3.msra.mxu1 %v1656_v14  ;;  %1385 = vmatprep.mubr.msk.f32.mxu1 %vm1548_vm2, %v1546_v11 }
  0x12   :  { %1383 = vmatprep.subr.mxu1 %v1546_v11  ;;  %1401 = vmatprep.subr.mxu0 %v1546_v11 }
  0x13   :  { %1384 = vmatpush3.msra.mxu1 %v1666_v15  ;;  %1402 = vmatpush3.msra.mxu0 %v1645_v12 }
  0x14   :  { %1386 = vmatmul.mubr.msk.f32.vlgmr.msra.gmra.mxu1 %vm200_vm3, %v1674_v16  ;;  %1388 = vmatprep.subr.mxu1 %v1546_v11 }
  0x15   :  { %1389 = vmatpush3.msra.mxu1 %v1633_v9  ;;  %1396 = vmatprep.mubr.msk.f32.mxu1 %vm1548_vm2, %v1546_v11 }
  0x16   :  { %1390 = vmatprep.subr.mxu1 %v1546_v11  ;;  %1403 = vmatprep.subr.mxu0 %v1546_v11 }
  0x17   :  { %1391 = vmatpush3.msra.mxu1 %v1645_v12  ;;  %1404 = vmatpush3.msra.mxu0 %v1656_v14 }
  0x18   :  { %1392 = vmatprep.subr.mxu1 %v1546_v11  ;;  %1405 = vmatprep.subr.mxu0 %v1546_v11 }
  0x19   :  { %1393 = vmatpush3.msra.mxu1 %v1656_v14  ;;  %1406 = vmatpush3.msra.mxu0 %v1666_v15 }
  0x1a   :  { %1394 = vmatprep.subr.mxu1 %v1546_v11  ;;  %1421 = vmatprep.subr.mxu0 %v1546_v11 }
  0x1b   :  { %1395 = vmatpush3.msra.mxu1 %v1666_v15  ;;  %1368 = vmatprep.mubr.msk.f32.mxu0 %vm50_vm1, %v33_v3 }
  0x1c   :  { %1410 = vmatprep.subr.mxu1 %v1546_v11  ;;  %1369 = vmatmul.mubr.msk.f32.gmra.mxu0 %vm50_vm1, %v34_v4 }
  0x1d   :  { %1407 = vmatprep.mubr.msk.f32.mxu0 %vm1548_vm2, %v1546_v11 }
  0x7f   :  { %v1712_v29 = vpop.permute.xlu0 %286 }
  0xcb   :  { %v1367_v18 = vpop.f32.mrf.mxu0  ;;  %v1373_v19 = vpop.f32.mrf.mxu1 }
  0xcc   :  { %v151_v20 = vadd.f32 %v1367_v18, %v1701_v17  ;;  %v171_v21 = vadd.f32 %v1373_v19, %v1701_v17 }
  0xcd   :  { %v145_v22 = vpop.f32.mrf.mxu0  ;;  %v165_v23 = vpop.f32.mrf.mxu1 }
  0xce   :  { %186 = vst.msk [vmem:[#allocation2 + $0x8] sm:$0xff] %vm184_vm4, %v151_v20  ;;  %190 = vst.msk [vmem:[#allocation2 + $0x28] sm:$0xff] %vm184_vm4, %v171_v21  ;;  %v146_v24 = vadd.f32 %v1701_v17, %v145_v22  ;;  %v166_v25 = vadd.f32 %v1701_v17, %v165_v23 }
  0xd0   :  { %185 = vst.msk [vmem:[#allocation2] sm:$0xff] %vm184_vm4, %v146_v24  ;;  %189 = vst.msk [vmem:[#allocation2 + $0x20] sm:$0xff] %vm184_vm4, %v166_v25  ;;  %v1376_v26 = vpop.f32.mrf.mxu1 }
  0xd1   :  { %v181_v27 = vadd.f32 %v1376_v26, %v1701_v17 }
  0xd2   :  { %v175_v28 = vpop.f32.mrf.mxu1 }
  0xd3   :  { %192 = vst.msk [vmem:[#allocation2 + $0x38] sm:$0xff] %vm184_vm4, %v181_v27  ;;  %v176_v30 = vadd.f32 %v1701_v17, %v175_v28 }
  0xd4   :  { %v270_v31 = vpop.f32.mrf.mxu1 }
  0xd5   :  { %191 = vst.msk [vmem:[#allocation2 + $0x30] sm:$0xff] %vm184_vm4, %v176_v30  ;;  %v289_v32 = vadd.f32 %v1712_v29, %v270_v31  ;;  %v322_v55 = vld [vmem:[#allocation2 + $0x8] sm:$0xff] }
  0xd6   :  { %v1387_v33 = vpop.f32.mrf.mxu1 }
  0xd7   :  { %291 = vrot.lane.b32.xlu0 %v289_v32, %s1547_s5  ;;  %v199_v34 = vld [vmem:[#allocation2] sm:$0xff] }
  0xd8   :  { %v274_v35 = vadd.f32 %v270_v31, %v199_v34 }
  0xda   :  { %v1268_v36 = vmul.f32 -1.442695, %v274_v35 }
  0xdc   :  { %1498 = vpow2.f32 %v1268_v36  ;;  %v1370_v10 = vpop.f32.mrf.mxu0 }
  0xdd   :  { %v161_v13 = vadd.f32 %v1370_v10, %v1701_v17 }
  0xdf   :  { %188 = vst.msk [vmem:[#allocation2 + $0x18] sm:$0xff] %vm184_vm4, %v161_v13 }
  0xe9   :  { %v1499_v37 = vpop.eup %1498 }
  0xea   :  { %v278_v38 = vadd.f32 1.0, %v1499_v37 }
  0xec   :  { %1500 = vrcp.f32 %v278_v38 }
  0xf9   :  { %v1501_v39 = vpop.eup %1500 }
 0x149   :  { %v292_v40 = vpop.permute.xlu0 %291 }
 0x14a   :  { %v294_v41 = vmul.f32 %v1501_v39, %v292_v40 }
 0x14c   :  { %296 = vrot.lane.b32.xlu1 %v294_v41, %s1547_s5 }
 0x1be   :  { %v297_v42 = vpop.permute.xlu1 %296 }
 0x1bf   :  { %v299_v43 = vadd.f32 %v297_v42, %v199_v34 }
 0x1c1   :  { %1502 = vtanh.f32 %v299_v43  ;;  %v542_v43 = vld [vmem:[#allocation2 + $0x18] sm:$0xff] }
 0x1ce   :  { %v1503_v44 = vpop.eup %1502 }
 0x1cf   :  { %302 = vrot.lane.b32.xlu1 %v1503_v44, %s1547_s5 }
 0x241   :  { %v303_v45 = vpop.permute.xlu1 %302 }
 0x242   :  { %v305_v46 = vsub.f32 %v1674_v16, %v303_v45  ;;  %v155_v16 = vpop.f32.mrf.mxu0 }
 0x243   :  { %v156_v18 = vadd.f32 %v1701_v17, %v155_v16 }
 0x244   :  { %307 = vrot.lane.b32.xlu0 %v305_v46, %s1549_s4 }
 0x245   :  { %187 = vst.msk [vmem:[#allocation2 + $0x10] sm:$0xff] %vm184_vm4, %v156_v18 }
 0x24c   :  { %v432_v22 = vld [vmem:[#allocation2 + $0x10] sm:$0xff] }
 0x2b6   :  { %v308_v47 = vpop.permute.xlu0 %307 }
 0x2b7   :  { %v310_v48 = vmul.f32 %v1501_v39, %v308_v47 }
 0x2b9   :  { %312 = vrot.lane.b32.xlu1 %v310_v48, %s1549_s4 }
 0x32b   :  { %v313_v49 = vpop.permute.xlu1 %312 }
 0x32c   :  { %v315_v50 = vadd.f32 %v1503_v44, %v313_v49 }
 0x32e   :  { %317 = vrot.lane.b32.xlu0 %v315_v50, %s1547_s5 }
 0x3a0   :  { %v318_v51 = vpop.permute.xlu0 %317 }
 0x3a1   :  { %320 = vst.msk [vmem:[#allocation3] sm:$0xff] %vm200_vm3, %v318_v51  ;;  %1397 = vmatmul.mubr.msk.f32.vlgmr.msra.gmra.mxu1 %vm200_vm3, %v318_v51 }
 0x3a2   :  { %1411 = vmatpush3.msra.mxu1 %v1633_v9  ;;  %1418 = vmatprep.mubr.msk.f32.mxu1 %vm1548_vm2, %v1546_v11 }
 0x3a3   :  { %1412 = vmatprep.subr.mxu1 %v1546_v11 }
 0x3a4   :  { %1413 = vmatpush3.msra.mxu1 %v1645_v12 }
 0x3a5   :  { %1414 = vmatprep.subr.mxu1 %v1546_v11 }
 0x3a6   :  { %1415 = vmatpush3.msra.mxu1 %v1656_v14 }
 0x3a7   :  { %1416 = vmatprep.subr.mxu1 %v1546_v11 }
 0x3a8   :  { %1417 = vmatpush3.msra.mxu1 %v1666_v15 }
 0x3a9   :  { %1432 = vmatprep.subr.mxu1 %v1546_v11 }
 0x461   :  { %v391_v52 = vpop.f32.mrf.mxu1 }
 0x462   :  { %v402_v53 = vadd.f32 %v391_v52, %v1712_v29  ;;  %v395_v56 = vadd.f32 %v391_v52, %v322_v55 }
 0x463   :  { %v1398_v54 = vpop.f32.mrf.mxu1 }
 0x464   :  { %404 = vrot.lane.b32.xlu1 %v402_v53, %s1547_s5  ;;  %v1271_v57 = vmul.f32 -1.442695, %v395_v56 }
 0x466   :  { %1504 = vpow2.f32 %v1271_v57 }
 0x473   :  { %v1505_v58 = vpop.eup %1504 }
 0x474   :  { %v399_v59 = vadd.f32 1.0, %v1505_v58 }
 0x476   :  { %1506 = vrcp.f32 %v399_v59 }
 0x483   :  { %v1507_v60 = vpop.eup %1506 }
 0x4d6   :  { %v405_v61 = vpop.permute.xlu1 %404 }
 0x4d7   :  { %v407_v62 = vmul.f32 %v1507_v60, %v405_v61 }
 0x4d9   :  { %409 = vrot.lane.b32.xlu0 %v407_v62, %s1547_s5 }
 0x54b   :  { %v410_v63 = vpop.permute.xlu0 %409 }
 0x54c   :  { %v412_v0 = vadd.f32 %v410_v63, %v322_v55  ;;  %v652_v63 = vld [vmem:[#allocation2 + $0x20] sm:$0xff] }
 0x54e   :  { %1508 = vtanh.f32 %v412_v0 }
 0x55b   :  { %v1509_v1 = vpop.eup %1508 }
 0x55c   :  { %v414_v2 = vsub.f32 %v315_v50, %v1509_v1 }
 0x55e   :  { %416 = vrot.lane.b32.xlu1 %v414_v2, %s1550_s19 }
 0x5d0   :  { %v417_v5 = vpop.permute.xlu1 %416 }
 0x5d1   :  { %v419_v6 = vmul.f32 %v1507_v60, %v417_v5 }
 0x5d3   :  { %421 = vrot.lane.b32.xlu0 %v419_v6, %s1549_s4 }
 0x645   :  { %v422_v7 = vpop.permute.xlu0 %421 }
 0x646   :  { %v424_v8 = vadd.f32 %v1509_v1, %v422_v7 }
 0x648   :  { %426 = vrot.lane.b32.xlu1 %v424_v8, %s1547_s5 }
 0x6ba   :  { %v427_v19 = vpop.permute.xlu1 %426 }
 0x6bb   :  { %430 = vst.msk [vmem:[#allocation3 + $0x8] sm:$0xff] %vm200_vm3, %v427_v19  ;;  %1408 = vmatmul.mubr.msk.f32.vlgmr.msra.gmra.mxu0 %vm200_vm3, %v427_v19 }
 0x6bc   :  { %1422 = vmatpush3.msra.mxu0 %v1633_v9  ;;  %1429 = vmatprep.mubr.msk.f32.mxu0 %vm1548_vm2, %v1546_v11 }
 0x6bd   :  { %1423 = vmatprep.subr.mxu0 %v1546_v11 }
 0x6be   :  { %1424 = vmatpush3.msra.mxu0 %v1645_v12 }
 0x6bf   :  { %1425 = vmatprep.subr.mxu0 %v1546_v11 }
 0x6c0   :  { %1426 = vmatpush3.msra.mxu0 %v1656_v14 }
 0x6c1   :  { %1427 = vmatprep.subr.mxu0 %v1546_v11 }
 0x6c2   :  { %1428 = vmatpush3.msra.mxu0 %v1666_v15 }
 0x6c3   :  { %1443 = vmatprep.subr.mxu0 %v1546_v11 }
 0x77b   :  { %v501_v17 = vpop.f32.mrf.mxu0 }
 0x77c   :  { %v512_v20 = vadd.f32 %v501_v17, %v1712_v29  ;;  %v505_v23 = vadd.f32 %v501_v17, %v432_v22 }
 0x77d   :  { %v1409_v21 = vpop.f32.mrf.mxu0 }
 0x77e   :  { %514 = vrot.lane.b32.xlu0 %v512_v20, %s1547_s5  ;;  %v1273_v24 = vmul.f32 -1.442695, %v505_v23 }
 0x780   :  { %1510 = vpow2.f32 %v1273_v24 }
 0x78d   :  { %v1511_v25 = vpop.eup %1510 }
 0x78e   :  { %v509_v26 = vadd.f32 1.0, %v1511_v25 }
 0x790   :  { %1512 = vrcp.f32 %v509_v26 }
 0x79d   :  { %v1513_v27 = vpop.eup %1512 }
 0x7f0   :  { %v515_v28 = vpop.permute.xlu0 %514 }
 0x7f1   :  { %v517_v30 = vmul.f32 %v1513_v27, %v515_v28 }
 0x7f3   :  { %519 = vrot.lane.b32.xlu1 %v517_v30, %s1547_s5 }
 0x865   :  { %v520_v31 = vpop.permute.xlu1 %519 }
 0x866   :  { %v522_v32 = vadd.f32 %v520_v31, %v432_v22 }
 0x868   :  { %1514 = vtanh.f32 %v522_v32  ;;  %v1103_v32 = vld [vmem:[%s1923_s6 + $0x18] sm:$0xff] }
 0x875   :  { %v1515_v33 = vpop.eup %1514 }
 0x876   :  { %v524_v34 = vsub.f32 %v424_v8, %v1515_v33 }
 0x878   :  { %526 = vrot.lane.b32.xlu0 %v524_v34, %s1550_s19 }
 0x8ea   :  { %v527_v35 = vpop.permute.xlu0 %526 }
 0x8eb   :  { %v529_v36 = vmul.f32 %v1513_v27, %v527_v35 }
 0x8ed   :  { %531 = vrot.lane.b32.xlu1 %v529_v36, %s1549_s4 }
 0x95f   :  { %v532_v37 = vpop.permute.xlu1 %531 }
 0x960   :  { %v534_v38 = vadd.f32 %v1515_v33, %v532_v37 }
 0x962   :  { %536 = vrot.lane.b32.xlu0 %v534_v38, %s1547_s5 }
 0x9d4   :  { %v537_v39 = vpop.permute.xlu0 %536 }
 0x9d5   :  { %540 = vst.msk [vmem:[#allocation3 + $0x10] sm:$0xff] %vm200_vm3, %v537_v39  ;;  %1419 = vmatmul.mubr.msk.f32.vlgmr.msra.gmra.mxu1 %vm200_vm3, %v537_v39  ;;  %v1092_v39 = vld [vmem:[#allocation3] sm:$0xff] }
 0x9d6   :  { %1433 = vmatpush3.msra.mxu1 %v1633_v9  ;;  %1440 = vmatprep.mubr.msk.f32.mxu1 %vm1548_vm2, %v1546_v11 }
 0x9d7   :  { %1434 = vmatprep.subr.mxu1 %v1546_v11 }
 0x9d8   :  { %1435 = vmatpush3.msra.mxu1 %v1645_v12 }
 0x9d9   :  { %1436 = vmatprep.subr.mxu1 %v1546_v11 }
 0x9da   :  { %1437 = vmatpush3.msra.mxu1 %v1656_v14 }
 0x9db   :  { %1438 = vmatprep.subr.mxu1 %v1546_v11 }
 0x9dc   :  { %1439 = vmatpush3.msra.mxu1 %v1666_v15 }
 0x9dd   :  { %1454 = vmatprep.subr.mxu1 %v1546_v11 }
 0xa95   :  { %v611_v40 = vpop.f32.mrf.mxu1 }
 0xa96   :  { %v622_v41 = vadd.f32 %v611_v40, %v1712_v29  ;;  %v615_v44 = vadd.f32 %v611_v40, %v542_v43  ;;  %v1101_v40 = vld [vmem:[%s1923_s6 + $0x8] sm:$0xff] }
 0xa97   :  { %v1420_v42 = vpop.f32.mrf.mxu1 }
 0xa98   :  { %624 = vrot.lane.b32.xlu1 %v622_v41, %s1547_s5  ;;  %v1275_v45 = vmul.f32 -1.442695, %v615_v44  ;;  %v1100_v41 = vld [vmem:[%s1923_s6] sm:$0xff]  ;;  %v1093_v42 = vld [vmem:[#allocation3 + $0x8] sm:$0xff] }
 0xa9a   :  { %1516 = vpow2.f32 %v1275_v45 }
 0xaa7   :  { %v1517_v46 = vpop.eup %1516 }
 0xaa8   :  { %v619_v47 = vadd.f32 1.0, %v1517_v46 }
 0xaaa   :  { %1518 = vrcp.f32 %v619_v47 }
 0xab7   :  { %v1519_v48 = vpop.eup %1518 }
 0xb0a   :  { %v625_v49 = vpop.permute.xlu1 %624 }
 0xb0b   :  { %v627_v50 = vmul.f32 %v1519_v48, %v625_v49 }
 0xb0d   :  { %629 = vrot.lane.b32.xlu0 %v627_v50, %s1547_s5  ;;  %v1855_v50 = vld [vmem:[%s1924_s7] ss:$0 sm:$0xff] }
 0xb7f   :  { %v630_v51 = vpop.permute.xlu0 %629 }
 0xb80   :  { %v632_v52 = vadd.f32 %v630_v51, %v542_v43  ;;  %v1094_v43 = vld [vmem:[#allocation3 + $0x10] sm:$0xff] }
 0xb82   :  { %1520 = vtanh.f32 %v632_v52 }
 0xb8f   :  { %v1521_v53 = vpop.eup %1520 }
 0xb90   :  { %v634_v54 = vsub.f32 %v534_v38, %v1521_v53  ;;  %v1102_v38 = vld [vmem:[%s1923_s6 + $0x10] sm:$0xff] }
 0xb92   :  { %636 = vrot.lane.b32.xlu1 %v634_v54, %s1550_s19 }
 0xc04   :  { %v637_v55 = vpop.permute.xlu1 %636 }
 0xc05   :  { %v639_v56 = vmul.f32 %v1519_v48, %v637_v55 }
 0xc07   :  { %641 = vrot.lane.b32.xlu0 %v639_v56, %s1549_s4 }
 0xc79   :  { %v642_v57 = vpop.permute.xlu0 %641 }
 0xc7a   :  { %v644_v58 = vadd.f32 %v1521_v53, %v642_v57 }
 0xc7c   :  { %646 = vrot.lane.b32.xlu1 %v644_v58, %s1547_s5 }
 0xcee   :  { %v647_v59 = vpop.permute.xlu1 %646 }
 0xcef   :  { %650 = vst.msk [vmem:[#allocation3 + $0x18] sm:$0xff] %vm200_vm3, %v647_v59  ;;  %1430 = vmatmul.mubr.msk.f32.vlgmr.msra.gmra.mxu0 %vm200_vm3, %v647_v59 }
 0xcf0   :  { %1444 = vmatpush3.msra.mxu0 %v1633_v9  ;;  %1451 = vmatprep.mubr.msk.f32.mxu0 %vm1548_vm2, %v1546_v11 }
 0xcf1   :  { %1445 = vmatprep.subr.mxu0 %v1546_v11 }
 0xcf2   :  { %1446 = vmatpush3.msra.mxu0 %v1645_v12 }
 0xcf3   :  { %1447 = vmatprep.subr.mxu0 %v1546_v11 }
 0xcf4   :  { %1448 = vmatpush3.msra.mxu0 %v1656_v14 }
 0xcf5   :  { %1449 = vmatprep.subr.mxu0 %v1546_v11 }
 0xcf6   :  { %1450 = vmatpush3.msra.mxu0 %v1666_v15  ;;  %v1095_v44 = vld [vmem:[#allocation3 + $0x18] sm:$0xff] }
 0xcf7   :  { %1465 = vmatprep.subr.mxu0 %v1103_v32 }
 0xdaf   :  { %v721_v60 = vpop.f32.mrf.mxu0 }
 0xdb0   :  { %v732_v61 = vadd.f32 %v721_v60, %v1712_v29  ;;  %v725_v0 = vadd.f32 %v721_v60, %v652_v63 }
 0xdb1   :  { %v1431_v62 = vpop.f32.mrf.mxu0 }
 0xdb2   :  { %734 = vrot.lane.b32.xlu0 %v732_v61, %s1547_s5  ;;  %v1277_v1 = vmul.f32 -1.442695, %v725_v0 }
 0xdb4   :  { %1522 = vpow2.f32 %v1277_v1 }
 0xdc1   :  { %v1523_v2 = vpop.eup %1522 }
 0xdc2   :  { %v729_v3 = vadd.f32 1.0, %v1523_v2 }
 0xdc4   :  { %1524 = vrcp.f32 %v729_v3 }
 0xdd1   :  { %v1525_v4 = vpop.eup %1524 }
 0xe24   :  { %v735_v5 = vpop.permute.xlu0 %734 }
 0xe25   :  { %v737_v6 = vmul.f32 %v1525_v4, %v735_v5 }
 0xe27   :  { %739 = vrot.lane.b32.xlu1 %v737_v6, %s1547_s5 }
 0xe99   :  { %v740_v7 = vpop.permute.xlu1 %739 }
 0xe9a   :  { %v742_v8 = vadd.f32 %v740_v7, %v652_v63  ;;  %v872_v63 = vld [vmem:[#allocation2 + $0x30] sm:$0xff] }
 0xe9c   :  { %1526 = vtanh.f32 %v742_v8 }
 0xea9   :  { %v1527_v10 = vpop.eup %1526 }
 0xeaa   :  { %v744_v13 = vsub.f32 %v644_v58, %v1527_v10 }
 0xeac   :  { %746 = vrot.lane.b32.xlu0 %v744_v13, %s1550_s19 }
 0xf1e   :  { %v747_v16 = vpop.permute.xlu0 %746 }
 0xf1f   :  { %v749_v18 = vmul.f32 %v1525_v4, %v747_v16 }
 0xf21   :  { %751 = vrot.lane.b32.xlu1 %v749_v18, %s1549_s4 }
 0xf93   :  { %v752_v19 = vpop.permute.xlu1 %751 }
 0xf94   :  { %v754_v17 = vadd.f32 %v1527_v10, %v752_v19 }
 0xf96   :  { %756 = vrot.lane.b32.xlu0 %v754_v17, %s1547_s5 }
0x1008   :  { %v757_v20 = vpop.permute.xlu0 %756 }
0x1009   :  { %760 = vst.msk [vmem:[#allocation3 + $0x20] sm:$0xff] %vm200_vm3, %v757_v20  ;;  %1441 = vmatmul.mubr.msk.f32.vlgmr.msra.gmra.mxu1 %vm200_vm3, %v757_v20 }
0x100a   :  { %1455 = vmatpush3.msra.mxu1 %v1633_v9  ;;  %1462 = vmatprep.mubr.msk.f32.mxu1 %vm1548_vm2, %v1546_v11  ;;  %v762_v9 = vld [vmem:[#allocation2 + $0x28] sm:$0xff] }
0x100b   :  { %1456 = vmatprep.subr.mxu1 %v1546_v11 }
0x100c   :  { %1457 = vmatpush3.msra.mxu1 %v1645_v12 }
0x100d   :  { %1458 = vmatprep.subr.mxu1 %v1546_v11 }
0x100e   :  { %1459 = vmatpush3.msra.mxu1 %v1656_v14 }
0x100f   :  { %1460 = vmatprep.subr.mxu1 %v1546_v11 }
0x1010   :  { %1461 = vmatpush3.msra.mxu1 %v1666_v15  ;;  %v1096_v45 = vld [vmem:[#allocation3 + $0x20] sm:$0xff] }
0x10c9   :  { %v831_v21 = vpop.f32.mrf.mxu1 }
0x10ca   :  { %v842_v22 = vadd.f32 %v831_v21, %v1712_v29  ;;  %v835_v24 = vadd.f32 %v831_v21, %v762_v9 }
0x10cb   :  { %v1442_v23 = vpop.f32.mrf.mxu1 }
0x10cc   :  { %844 = vrot.lane.b32.xlu1 %v842_v22, %s1547_s5  ;;  %v1279_v25 = vmul.f32 -1.442695, %v835_v24  ;;  %v982_v24 = vld [vmem:[#allocation2 + $0x38] sm:$0xff] }
0x10ce   :  { %1528 = vpow2.f32 %v1279_v25 }
0x10db   :  { %v1529_v26 = vpop.eup %1528 }
0x10dc   :  { %v839_v12 = vadd.f32 1.0, %v1529_v26 }
0x10de   :  { %1530 = vrcp.f32 %v839_v12 }
0x10eb   :  { %v1531_v27 = vpop.eup %1530 }
0x113e   :  { %v845_v28 = vpop.permute.xlu1 %844 }
0x113f   :  { %v847_v14 = vmul.f32 %v1531_v27, %v845_v28 }
0x1141   :  { %849 = vrot.lane.b32.xlu0 %v847_v14, %s1547_s5 }
0x11b3   :  { %v850_v11 = vpop.permute.xlu0 %849 }
0x11b4   :  { %v852_v15 = vadd.f32 %v850_v11, %v762_v9 }
0x11b6   :  { %1532 = vtanh.f32 %v852_v15 }
0x11c3   :  { %v1533_v30 = vpop.eup %1532 }
0x11c4   :  { %v854_v31 = vsub.f32 %v754_v17, %v1533_v30 }
0x11c6   :  { %856 = vrot.lane.b32.xlu1 %v854_v31, %s1550_s19 }
0x1238   :  { %v857_v33 = vpop.permute.xlu1 %856 }
0x1239   :  { %v859_v34 = vmul.f32 %v1531_v27, %v857_v33 }
0x123b   :  { %861 = vrot.lane.b32.xlu0 %v859_v34, %s1549_s4 }
0x12ad   :  { %v862_v35 = vpop.permute.xlu0 %861 }
0x12ae   :  { %v1829_v36 = vadd.f32 %v1533_v30, %v862_v35 }
0x12b0   :  { %866 = vrot.lane.b32.xlu1 %v1829_v36, %s1547_s5 }
0x1322   :  { %v867_v37 = vpop.permute.xlu1 %866 }
0x1323   :  { %870 = vst.msk [vmem:[#allocation3 + $0x28] sm:$0xff] %vm200_vm3, %v867_v37  ;;  %1452 = vmatmul.mubr.msk.f32.vlgmr.msra.gmra.mxu0 %vm200_vm3, %v867_v37 }
0x1324   :  { %1466 = vmatpush3.msra.mxu0 %v1103_v32  ;;  %1473 = vmatprep.mubr.msk.f32.mxu0 %vm200_vm3, %v1092_v39 }
0x1325   :  { %1467 = vmatprep.subr.mxu0 %v1102_v38 }
0x1326   :  { %1468 = vmatpush3.msra.mxu0 %v1102_v38 }
0x1327   :  { %1469 = vmatprep.subr.mxu0 %v1101_v40 }
0x1328   :  { %1470 = vmatpush3.msra.mxu0 %v1101_v40 }
0x1329   :  { %1471 = vmatprep.subr.mxu0 %v1100_v41 }
0x132a   :  { %1472 = vmatpush3.msra.mxu0 %v1100_v41  ;;  %v1097_v46 = vld [vmem:[#allocation3 + $0x28] sm:$0xff] }
0x132b   :  { %1474 = vmatmul.mubr.msk.f32.vlgmr.msra.gmra.mxu0 %vm200_vm3, %v1093_v42 }
0x132c   :  { %1476 = vmatprep.mubr.msk.f32.mxu0 %vm200_vm3, %v1094_v43 }
0x132f   :  { %1477 = vmatmul.mubr.msk.f32.gmra.mxu0 %vm200_vm3, %v1095_v44 }
0x1330   :  { %1479 = vmatprep.mubr.msk.f32.mxu0 %vm200_vm3, %v1096_v45 }
0x1333   :  { %1480 = vmatmul.mubr.msk.f32.gmra.mxu0 %vm200_vm3, %v1097_v46 }
0x13e3   :  { %v941_v47 = vpop.f32.mrf.mxu0 }
0x13e4   :  { %v952_v48 = vadd.f32 %v941_v47, %v1712_v29  ;;  %v945_v0 = vadd.f32 %v941_v47, %v872_v63 }
0x13e5   :  { %v1453_v49 = vpop.f32.mrf.mxu0 }
0x13e6   :  { %954 = vrot.lane.b32.xlu0 %v952_v48, %s1547_s5  ;;  %v1281_v1 = vmul.f32 -1.442695, %v945_v0 }
0x13e8   :  { %1534 = vpow2.f32 %v1281_v1 }
0x13eb   :  { %v1475_v51 = vpop.f32.mrf.mxu0 }
0x13ec   :  { %v1207_v52 = vadd.f32 %v1475_v51, %v1855_v50 }
0x13ed   :  { %v1201_v53 = vpop.f32.mrf.mxu0 }
0x13ee   :  { %1242 = vst.msk [vmem:[%s1925_s8 + $0x8] sm:$0xff] %vm1240_vm5, %v1207_v52  ;;  %v1202_v54 = vadd.f32 %v1855_v50, %v1201_v53 }
0x13ef   :  { %v1478_v55 = vpop.f32.mrf.mxu0 }
0x13f0   :  { %1241 = vst.msk [vmem:[%s1925_s8] sm:$0xff] %vm1240_vm5, %v1202_v54  ;;  %v1217_v56 = vadd.f32 %v1478_v55, %v1855_v50 }
0x13f1   :  { %v1211_v57 = vpop.f32.mrf.mxu0 }
0x13f2   :  { %1244 = vst.msk [vmem:[%s1925_s8 + $0x18] sm:$0xff] %vm1240_vm5, %v1217_v56  ;;  %v1212_v58 = vadd.f32 %v1855_v50, %v1211_v57 }
0x13f3   :  { %v1481_v59 = vpop.f32.mrf.mxu0 }
0x13f4   :  { %1243 = vst.msk [vmem:[%s1925_s8 + $0x10] sm:$0xff] %vm1240_vm5, %v1212_v58  ;;  %v1227_v60 = vadd.f32 %v1481_v59, %v1855_v50 }
0x13f5   :  { %v1221_v61 = vpop.f32.mrf.mxu0  ;;  %v1535_v2 = vpop.eup %1534 }
0x13f6   :  { %1246 = vst.msk [vmem:[%s1925_s8 + $0x28] sm:$0xff] %vm1240_vm5, %v1227_v60  ;;  %v1222_v62 = vadd.f32 %v1855_v50, %v1221_v61  ;;  %v949_v3 = vadd.f32 1.0, %v1535_v2 }
0x13f8   :  { %1245 = vst.msk [vmem:[%s1925_s8 + $0x20] sm:$0xff] %vm1240_vm5, %v1222_v62  ;;  %1536 = vrcp.f32 %v949_v3 }
0x1405   :  { %v1537_v4 = vpop.eup %1536 }
0x1458   :  { %v955_v5 = vpop.permute.xlu0 %954 }
0x1459   :  { %v957_v6 = vmul.f32 %v1537_v4, %v955_v5 }
0x145b   :  { %959 = vrot.lane.b32.xlu1 %v957_v6, %s1547_s5 }
0x14cd   :  { %v960_v7 = vpop.permute.xlu1 %959 }
0x14ce   :  { %v962_v8 = vadd.f32 %v960_v7, %v872_v63 }
0x14d0   :  { %1538 = vtanh.f32 %v962_v8 }
0x14dd   :  { %v1539_v10 = vpop.eup %1538 }
0x14de   :  { %v964_v13 = vsub.f32 %v1829_v36, %v1539_v10 }
0x14e0   :  { %966 = vrot.lane.b32.xlu0 %v964_v13, %s1550_s19 }
0x1552   :  { %v967_v16 = vpop.permute.xlu0 %966 }
0x1553   :  { %v969_v18 = vmul.f32 %v1537_v4, %v967_v16 }
0x1555   :  { %971 = vrot.lane.b32.xlu1 %v969_v18, %s1549_s4 }
0x15c7   :  { %v972_v19 = vpop.permute.xlu1 %971 }
0x15c8   :  { %v974_v17 = vadd.f32 %v1539_v10, %v972_v19 }
0x15ca   :  { %976 = vrot.lane.b32.xlu0 %v974_v17, %s1547_s5 }
0x163c   :  { %v977_v20 = vpop.permute.xlu0 %976 }
0x163d   :  { %980 = vst.msk [vmem:[#allocation3 + $0x30] sm:$0xff] %vm200_vm3, %v977_v20  ;;  %1463 = vmatmul.mubr.msk.f32.vlgmr.msra.gmra.mxu1 %vm200_vm3, %v977_v20 }
0x1644   :  { %v1098_v21 = vld [vmem:[#allocation3 + $0x30] sm:$0xff] }
0x1645   :  { %1482 = vmatprep.mubr.msk.f32.mxu0 %vm200_vm3, %v1098_v21 }
0x16fd   :  { %v1051_v22 = vpop.f32.mrf.mxu1 }
0x16fe   :  { %v1062_v23 = vadd.f32 %v1051_v22, %v1712_v29  ;;  %v1055_v25 = vadd.f32 %v1051_v22, %v982_v24 }
0x16ff   :  { %v1464_v9 = vpop.f32.mrf.mxu1 }
0x1700   :  { %1064 = vrot.lane.b32.xlu1 %v1062_v23, %s1547_s5  ;;  %v1283_v26 = vmul.f32 -1.442695, %v1055_v25 }
0x1702   :  { %1540 = vpow2.f32 %v1283_v26 }
0x170f   :  { %v1541_v12 = vpop.eup %1540 }
0x1710   :  { %v1059_v27 = vadd.f32 1.0, %v1541_v12 }
0x1712   :  { %1542 = vrcp.f32 %v1059_v27 }
0x171f   :  { %v1543_v28 = vpop.eup %1542 }
0x1772   :  { %v1065_v14 = vpop.permute.xlu1 %1064 }
0x1773   :  { %v1067_v11 = vmul.f32 %v1543_v28, %v1065_v14 }
0x1775   :  { %1069 = vrot.lane.b32.xlu0 %v1067_v11, %s1547_s5 }
0x17e7   :  { %v1070_v15 = vpop.permute.xlu0 %1069 }
0x17e8   :  { %v1072_v30 = vadd.f32 %v1070_v15, %v982_v24 }
0x17ea   :  { %1544 = vtanh.f32 %v1072_v30 }
0x17f7   :  { %v1545_v31 = vpop.eup %1544 }
0x17f8   :  { %v1074_v29 = vsub.f32 %v974_v17, %v1545_v31 }
0x17fa   :  { %1076 = vrot.lane.b32.xlu1 %v1074_v29, %s1550_s19 }
0x186c   :  { %v1077_v32 = vpop.permute.xlu1 %1076 }
0x186d   :  { %v1079_v33 = vmul.f32 %v1543_v28, %v1077_v32 }
0x186f   :  { %1081 = vrot.lane.b32.xlu0 %v1079_v33, %s1549_s4 }
0x18e1   :  { %v1082_v34 = vpop.permute.xlu0 %1081 }
0x18e2   :  { %v1084_v35 = vadd.f32 %v1545_v31, %v1082_v34 }
0x18e4   :  { %1086 = vrot.lane.b32.xlu1 %v1084_v35, %s1547_s5 }
0x1956   :  { %v1087_v36 = vpop.permute.xlu1 %1086 }
0x1957   :  { %1090 = vst.msk [vmem:[#allocation3 + $0x38] sm:$0xff] %vm200_vm3, %v1087_v36  ;;  %1091 = vst.msk [vmem:[%s1926_s9] sm:$0xff] %vm200_vm3, %v1087_v36 }
0x195e   :  { %v1099_v37 = vld [vmem:[#allocation3 + $0x38] sm:$0xff] }
0x195f   :  { %1483 = vmatmul.mubr.msk.f32.gmra.mxu0 %vm200_vm3, %v1099_v37 }
0x1a1f   :  { %v1484_v38 = vpop.f32.mrf.mxu0 }
0x1a20   :  { %v1237_v39 = vadd.f32 %v1484_v38, %v1855_v50 }
0x1a21   :  { %v1231_v40 = vpop.f32.mrf.mxu0 }
0x1a22   :  { %1248 = vst.msk [vmem:[%s1925_s8 + $0x38] sm:$0xff] %vm1240_vm5, %v1237_v39  ;;  %v1232_v41 = vadd.f32 %v1855_v50, %v1231_v40 }
0x1a24   :  { %1247 = vst.msk [vmem:[%s1925_s8 + $0x30] sm:$0xff] %vm1240_vm5, %v1232_v41 }

</bundles_post_ra>
